<compile_context>
chip_gen: v7x
topology: tpu7x:2x2x1
jax: 0.10.0
libtpu: 0.0.40
codegen_flags: <defaults>
</compile_context>

<pallas_src>
import functools

import jax
import jax.numpy as jnp
from jax.experimental import pallas as pl
from jax.experimental.pallas import tpu as pltpu

_LANE = 128


def _round_up(x, m):
    return ((x + m - 1) // m) * m


def _fused_mlp_kernel(*refs, num_layers, slope):
    """Fused Discriminator MLP on one batch tile.

    Layout: features on sublanes, batch on lanes (transposed vs. PyTorch), so
    the final Dout=1 layer writes a lane-dense (1, TILE_N) row.

    refs = (x_ref, w0, b0, w1, b1, ..., wL, bL, o_ref)
      x_ref : (Din0_pad, TILE_N)   activation tile (batch on lane axis)
      w_l   : (Dout_pad, Din_pad)  transposed, zero-padded weights (VMEM-resident)
      b_l   : (Dout_pad, 1)        zero-padded bias, f32
      o_ref : (1, TILE_N)          sigmoid(logit) for this batch tile
    """
    x_ref, o_ref = refs[0], refs[-1]
    wb = refs[1:-1]

    h = x_ref[...]                          # f32 or bf16 (MXU input dtype)
    for li in range(num_layers):
        w = wb[2 * li][...]                 # (Dout_pad, Din_pad)
        b = wb[2 * li + 1][...]             # (Dout_pad, 1), f32
        # MXU matmul in the weights' dtype, f32 accumulate; epilogue in f32.
        y = jnp.dot(w, h.astype(w.dtype), preferred_element_type=jnp.float32) + b
        if li < num_layers - 1:
            # LeakyReLU (VPU). Zero-padded rows stay exactly zero.
            h = jnp.where(y >= 0.0, y, jnp.float32(slope) * y)
        else:
            logit = y[0:1, :]               # real output row (Dout = 1)
            # Sigmoid: exp on EUP, one divide on VPU over a single (1, TILE_N) row.
            o_ref[...] = (1.0 / (1.0 + jnp.exp(-logit))).astype(o_ref.dtype)


def discriminator_forward(params, x, leaky_relu_slope, *,
                          mxu_dtype=jnp.float32, tile_n=None):
    """Matches Discriminator.forward: hidden Linear+LeakyReLU, Linear(1)+Sigmoid, view(-1).

    params: list of (w, b) with w shaped (in_features, out_features) (transpose
            of PyTorch nn.Linear.weight), b shaped (out_features,).
    x:      (N, input_dim) float32.
    mxu_dtype: jnp.float32 (exact) or jnp.bfloat16 (recommended on v6e/v7x).
    """
    n, d_in = x.shape
    num_layers = len(params)

    if tile_n is None:
        tile_n = min(512, _round_up(max(n, 1), _LANE))
    n_pad = _round_up(n, tile_n)

    # ---- layout plumbing (plain XLA ops in the wrapper): pad feature dims to a
    # multiple of 128 and put the batch on the lane axis. Zero padding is exact:
    # padded features/rows contribute 0 through every layer.
    d0_pad = _round_up(d_in, _LANE)
    x_t = jnp.zeros((d0_pad, n_pad), mxu_dtype)
    x_t = x_t.at[:d_in, :n].set(x.T.astype(mxu_dtype))

    operands = [x_t]
    in_specs = [pl.BlockSpec((d0_pad, tile_n), lambda i: (0, i))]
    for (w, b) in params:
        di, do = w.shape
        di_p, do_p = _round_up(di, _LANE), _round_up(do, _LANE)
        wt = jnp.zeros((do_p, di_p), mxu_dtype).at[:do, :di].set(w.T.astype(mxu_dtype))
        bp = jnp.zeros((do_p, 1), jnp.float32).at[:do, 0].set(b.astype(jnp.float32))
        operands += [wt, bp]
        # Constant index_map -> weights/biases stay resident in VMEM across the grid.
        in_specs.append(pl.BlockSpec((do_p, di_p), lambda i: (0, 0)))
        in_specs.append(pl.BlockSpec((do_p, 1), lambda i: (0, 0)))

    kernel = functools.partial(_fused_mlp_kernel, num_layers=num_layers,
                               slope=float(leaky_relu_slope))

    out = pl.pallas_call(
        kernel,
        out_shape=jax.ShapeDtypeStruct((1, n_pad), jnp.float32),
        grid=(n_pad // tile_n,),
        in_specs=in_specs,
        out_specs=pl.BlockSpec((1, tile_n), lambda i: (0, i)),   # lane-dense output
        compiler_params=pltpu.CompilerParams(
            dimension_semantics=("parallel",),                   # megacore on v7x
        ),
    )(*operands)

    return out[0, :n]                                            # .view(-1)


def init_discriminator_params(key, input_dim, disc_hidden_dims):
    """Deterministic synthetic params. Shapes mirror nn.Linear(input_dim, h)."""
    params = []
    dims = [input_dim] + list(disc_hidden_dims) + [1]
    for i in range(len(dims) - 1):
        d_in, d_out = dims[i], dims[i + 1]
        key, kw, kb = jax.random.split(key, 3)
        # torch default init: U(-1/sqrt(fan_in), 1/sqrt(fan_in))
        bound = 1.0 / jnp.sqrt(jnp.float32(d_in))
        w = jax.random.uniform(kw, (d_in, d_out), jnp.float32, -bound, bound)
        b = jax.random.uniform(kb, (d_out,), jnp.float32, -bound, bound)
        params.append((w, b))
    return params


def reference_forward(params, x, leaky_relu_slope):
    h = x
    for (w, b) in params[:-1]:
        h = h @ w + b
        h = jnp.where(h >= 0, h, leaky_relu_slope * h)
    w, b = params[-1]
    return (1.0 / (1.0 + jnp.exp(-(h @ w + b)))).reshape(-1)


if __name__ == "__main__":
    key = jax.random.PRNGKey(0)
    k_param, k_x, k_x2 = jax.random.split(key, 3)

    batch = 8
    input_dim = 32
    disc_hidden_dims = [64, 32]
    leaky_relu_slope = 0.2

    params = init_discriminator_params(k_param, input_dim, disc_hidden_dims)
    x = jax.random.normal(k_x, (batch, input_dim), jnp.float32)

    # Small-batch check (single tile), full f32.
    out = jax.block_until_ready(discriminator_forward(params, x, leaky_relu_slope))
    ref = reference_forward(params, x, leaky_relu_slope)
    assert out.shape == (batch,)
    assert jnp.allclose(out, ref, atol=1e-5, rtol=1e-4), (out, ref)

    # Larger, non-multiple-of-tile batch: exercises the batch grid + zero padding.
    x_big = jax.random.normal(k_x2, (1000, input_dim), jnp.float32)
    out_big = jax.block_until_ready(
        discriminator_forward(params, x_big, leaky_relu_slope))
    ref_big = reference_forward(params, x_big, leaky_relu_slope)
    assert out_big.shape == (1000,)
    assert jnp.allclose(out_big, ref_big, atol=1e-5, rtol=1e-4)

    # bf16 MXU inputs (v6e/v7x fast path), f32 accumulate + f32 epilogue.
    out_bf16 = jax.block_until_ready(
        discriminator_forward(params, x_big, leaky_relu_slope,
                              mxu_dtype=jnp.bfloat16))
    assert jnp.allclose(out_bf16, ref_big, atol=5e-2)

    print("KERNEL_OK")
</pallas_src>

<mosaic_0001>
module attributes {stable_mosaic.version = 11 : i64} {
  func.func @_fused_mlp_kernel(%arg0: i32, %arg1: memref<128x128xf32, #tpu.memory_space<vmem>>, %arg2: memref<128x128xf32, #tpu.memory_space<vmem>>, %arg3: memref<128x1xf32, #tpu.memory_space<vmem>>, %arg4: memref<128x128xf32, #tpu.memory_space<vmem>>, %arg5: memref<128x1xf32, #tpu.memory_space<vmem>>, %arg6: memref<128x128xf32, #tpu.memory_space<vmem>>, %arg7: memref<128x1xf32, #tpu.memory_space<vmem>>, %arg8: memref<1x128xf32, #tpu.memory_space<vmem>>) attributes {dimension_semantics = [#tpu.dimension_semantics<parallel>], iteration_bounds = array<i64: 1>, scalar_prefetch = 0 : i64, scratch_operands = 0 : i64, tpu.core_type = #tpu.core_type<tc>, window_params = [{transform_indices = @transform_0, window_bounds = array<i64: 128, 128>}, {pipeline_mode = #tpu.pipeline_mode<synchronous>, transform_indices = @transform_1, window_bounds = array<i64: 128, 128>}, {pipeline_mode = #tpu.pipeline_mode<synchronous>, transform_indices = @transform_2, window_bounds = array<i64: 128, 1>}, {pipeline_mode = #tpu.pipeline_mode<synchronous>, transform_indices = @transform_3, window_bounds = array<i64: 128, 128>}, {pipeline_mode = #tpu.pipeline_mode<synchronous>, transform_indices = @transform_4, window_bounds = array<i64: 128, 1>}, {pipeline_mode = #tpu.pipeline_mode<synchronous>, transform_indices = @transform_5, window_bounds = array<i64: 128, 128>}, {pipeline_mode = #tpu.pipeline_mode<synchronous>, transform_indices = @transform_6, window_bounds = array<i64: 128, 1>}, {transform_indices = @transform_7, window_bounds = array<i64: 1, 128>}]} {
    %c0 = arith.constant 0 : index
    %c0_0 = arith.constant 0 : index
    %0 = vector.load %arg1[%c0, %c0_0] : memref<128x128xf32, #tpu.memory_space<vmem>>, vector<128x128xf32>
    %c0_1 = arith.constant 0 : index
    %c0_2 = arith.constant 0 : index
    %1 = vector.load %arg2[%c0_1, %c0_2] : memref<128x128xf32, #tpu.memory_space<vmem>>, vector<128x128xf32>
    %c0_3 = arith.constant 0 : index
    %c0_4 = arith.constant 0 : index
    %2 = vector.load %arg3[%c0_3, %c0_4] : memref<128x1xf32, #tpu.memory_space<vmem>>, vector<128x1xf32>
    %cst = arith.constant dense<0.000000e+00> : vector<128x128xf32>
    %3 = tpu.matmul %1, %0, %cst {dimension_numbers = #tpu.dot_dimension_numbers<[1], [0], [0], [1], [0, 0, 1, 1], [], []>} : vector<128x128xf32>, vector<128x128xf32>, vector<128x128xf32> -> vector<128x128xf32>
    %4 = vector.broadcast %2 : vector<128x1xf32> to vector<128x128xf32>
    %5 = arith.addf %3, %4 : vector<128x128xf32>
    %cst_5 = arith.constant 0.000000e+00 : f32
    %6 = vector.broadcast %cst_5 : f32 to vector<128x128xf32>
    %7 = arith.cmpf oge, %5, %6 : vector<128x128xf32>
    %cst_6 = arith.constant 2.000000e-01 : f32
    %8 = vector.broadcast %cst_6 : f32 to vector<128x128xf32>
    %9 = arith.mulf %8, %5 : vector<128x128xf32>
    %10 = arith.select %7, %5, %9 : vector<128x128xi1>, vector<128x128xf32>
    %c0_7 = arith.constant 0 : index
    %c0_8 = arith.constant 0 : index
    %11 = vector.load %arg4[%c0_7, %c0_8] : memref<128x128xf32, #tpu.memory_space<vmem>>, vector<128x128xf32>
    %c0_9 = arith.constant 0 : index
    %c0_10 = arith.constant 0 : index
    %12 = vector.load %arg5[%c0_9, %c0_10] : memref<128x1xf32, #tpu.memory_space<vmem>>, vector<128x1xf32>
    %cst_11 = arith.constant dense<0.000000e+00> : vector<128x128xf32>
    %13 = tpu.matmul %11, %10, %cst_11 {dimension_numbers = #tpu.dot_dimension_numbers<[1], [0], [0], [1], [0, 0, 1, 1], [], []>} : vector<128x128xf32>, vector<128x128xf32>, vector<128x128xf32> -> vector<128x128xf32>
    %14 = vector.broadcast %12 : vector<128x1xf32> to vector<128x128xf32>
    %15 = arith.addf %13, %14 : vector<128x128xf32>
    %cst_12 = arith.constant 0.000000e+00 : f32
    %16 = vector.broadcast %cst_12 : f32 to vector<128x128xf32>
    %17 = arith.cmpf oge, %15, %16 : vector<128x128xf32>
    %cst_13 = arith.constant 2.000000e-01 : f32
    %18 = vector.broadcast %cst_13 : f32 to vector<128x128xf32>
    %19 = arith.mulf %18, %15 : vector<128x128xf32>
    %20 = arith.select %17, %15, %19 : vector<128x128xi1>, vector<128x128xf32>
    %c0_14 = arith.constant 0 : index
    %c0_15 = arith.constant 0 : index
    %21 = vector.load %arg6[%c0_14, %c0_15] : memref<128x128xf32, #tpu.memory_space<vmem>>, vector<128x128xf32>
    %c0_16 = arith.constant 0 : index
    %c0_17 = arith.constant 0 : index
    %22 = vector.load %arg7[%c0_16, %c0_17] : memref<128x1xf32, #tpu.memory_space<vmem>>, vector<128x1xf32>
    %cst_18 = arith.constant dense<0.000000e+00> : vector<128x128xf32>
    %23 = tpu.matmul %21, %20, %cst_18 {dimension_numbers = #tpu.dot_dimension_numbers<[1], [0], [0], [1], [0, 0, 1, 1], [], []>} : vector<128x128xf32>, vector<128x128xf32>, vector<128x128xf32> -> vector<128x128xf32>
    %24 = vector.broadcast %22 : vector<128x1xf32> to vector<128x128xf32>
    %25 = arith.addf %23, %24 : vector<128x128xf32>
    %26 = vector.extract_strided_slice %25 {offsets = [0, 0], sizes = [1, 128], strides = [1, 1]} : vector<128x128xf32> to vector<1x128xf32>
    %cst_19 = arith.constant 0.000000e+00 : f32
    %27 = vector.broadcast %cst_19 : f32 to vector<1x128xf32>
    %28 = arith.subf %27, %26 : vector<1x128xf32>
    %29 = math.exp %28 : vector<1x128xf32>
    %cst_20 = arith.constant 1.000000e+00 : f32
    %30 = vector.broadcast %cst_20 : f32 to vector<1x128xf32>
    %31 = arith.addf %30, %29 : vector<1x128xf32>
    %cst_21 = arith.constant 1.000000e+00 : f32
    %32 = vector.broadcast %cst_21 : f32 to vector<1x128xf32>
    %33 = arith.divf %32, %31 : vector<1x128xf32>
    %c0_22 = arith.constant 0 : index
    %c0_23 = arith.constant 0 : index
    %34 = vector.load %arg8[%c0_22, %c0_23] : memref<1x128xf32, #tpu.memory_space<vmem>>, vector<1x128xf32>
    tpu.vector_store %arg8[%c0_22, %c0_23], %33 {strides = array<i32>} : memref<1x128xf32, #tpu.memory_space<vmem>>, vector<1x128xf32>,
    return
  }
  func.func @transform_0(%arg0: i32) -> (i32, i32) {
    %c0_i32 = arith.constant 0 : i32
    %c0_i32_0 = arith.constant 0 : i32
    return %c0_i32, %arg0 : i32, i32
  }
  func.func @transform_1(%arg0: i32) -> (i32, i32) {
    %c0_i32 = arith.constant 0 : i32
    %c0_i32_0 = arith.constant 0 : i32
    %c0_i32_1 = arith.constant 0 : i32
    return %c0_i32, %c0_i32_0 : i32, i32
  }
  func.func @transform_2(%arg0: i32) -> (i32, i32) {
    %c0_i32 = arith.constant 0 : i32
    %c0_i32_0 = arith.constant 0 : i32
    %c0_i32_1 = arith.constant 0 : i32
    return %c0_i32, %c0_i32_0 : i32, i32
  }
  func.func @transform_3(%arg0: i32) -> (i32, i32) {
    %c0_i32 = arith.constant 0 : i32
    %c0_i32_0 = arith.constant 0 : i32
    %c0_i32_1 = arith.constant 0 : i32
    return %c0_i32, %c0_i32_0 : i32, i32
  }
  func.func @transform_4(%arg0: i32) -> (i32, i32) {
    %c0_i32 = arith.constant 0 : i32
    %c0_i32_0 = arith.constant 0 : i32
    %c0_i32_1 = arith.constant 0 : i32
    return %c0_i32, %c0_i32_0 : i32, i32
  }
  func.func @transform_5(%arg0: i32) -> (i32, i32) {
    %c0_i32 = arith.constant 0 : i32
    %c0_i32_0 = arith.constant 0 : i32
    %c0_i32_1 = arith.constant 0 : i32
    return %c0_i32, %c0_i32_0 : i32, i32
  }
  func.func @transform_6(%arg0: i32) -> (i32, i32) {
    %c0_i32 = arith.constant 0 : i32
    %c0_i32_0 = arith.constant 0 : i32
    %c0_i32_1 = arith.constant 0 : i32
    return %c0_i32, %c0_i32_0 : i32, i32
  }
  func.func @transform_7(%arg0: i32) -> (i32, i32) {
    %c0_i32 = arith.constant 0 : i32
    %c0_i32_0 = arith.constant 0 : i32
    return %c0_i32, %arg0 : i32, i32
  }
}

</mosaic_0001>

<bundles_post_ra>
// kernel: tpu_custom_call.1
= control target key start
LH: loop header
LB: loop body
LE: loop exit
PB: predicated region body
PF: predicated region fallthrough
CT: control target
= control target key end

     0   :  { %12 = vsyncpa [#allocation3], 0  ;;  %s1663_s0 = inlined_call_operand.vmem [shape: f32[128,128], index: 0, kind: input, shape index: {}]   ;;  %s1664_s1 = inlined_call_operand.vmem [shape: f32[128,128], index: 1, kind: input, shape index: {}]   ;;  %s1665_s2 = inlined_call_operand.vmem [shape: f32[128,1], index: 2, kind: input, shape index: {}]   ;;  %s1666_s3 = inlined_call_operand.vmem [shape: f32[128,128], index: 3, kind: input, shape index: {}]   ;;  %s1667_s4 = inlined_call_operand.vmem [shape: f32[128,1], index: 4, kind: input, shape index: {}]   ;;  %s1668_s5 = inlined_call_operand.hbm [shape: f32[128,128], index: 5, kind: input, shape index: {}]   ;;  %s1669_s6 = inlined_call_operand.vmem [shape: f32[128,1], index: 6, kind: input, shape index: {}]   ;;  %s1670_s7 = inlined_call_operand.hbm [shape: f32[1,128], index: 7, kind: output, shape index: {}]  }
   0x1   :  { %13 = vsyncpa [#allocation4], 0  ;;  %s1351_s24 = smov [#allocation2]   ;;  %s1303_s28 = scalar_lea.hbm %s1668_s5, 2048 }
   0x2   :  { %s29_s25 = sshll.u32 %s1351_s24, 4  ;;  %p1304_p0 = scmp.ne.s32.totalorder %s1668_s5, %s1303_s28  ;;  %s30_s25 = int_to_ptr.vmem [resolvable:$true] %s29_s25 }
   0x3   :  { %p1307_p1 = scmp.lt.u32.totalorder %s1303_s28, %s1668_s5 }
   0x5   :  { %p1309_p2 = pnand %p1307_p1, %p1304_p0 }
   0x7   :  { %1312 = shalt.err (!%p1309_p2)
}
   0x8   :  { %s1313_s10 = scalar_lea.vmem %s30_s25, 2048  ;;  %p1318_p4 = scmp.lt.s32.totalorder %s30_s25, %s30_s25 }
   0x9   :  { %p1314_p3 = scmp.ne.s32.totalorder %s30_s25, %s1313_s10  ;;  %p1319_p5 = scmp.lt.s32.totalorder %s1313_s10, %s1313_s10 }
   0xb   :  { %p1320_p6 = por %p1319_p5, %p1318_p4 }
   0xd   :  { %p1321_p7 = pnand %p1320_p6, %p1314_p3 }
   0xf   :  { %1324 = shalt.err (!%p1321_p7)
}
  0x10   :  { %s1352_s11 = smov 128   ;;  %s1353_s12 = smov 8  }
  0x11   :  { %35 = dma.hbm_to_vmem [thread:$0]  %s1668_s5, 2048, %s30_s25, [#allocation3], %s1352_s11, %s1352_s11, %s1353_s12  }
  0x12   :  { %1347 = dma.done.wait [#allocation3], 2048  }
  0x13   :  { %1348 = vsyncadd [#allocation3], 4294965248  ;;  %v1354_v0 = vmov 0   ;;  %v41_v1 = vld [vmem:[%s1663_s0] sm:$0xff]  ;;  %v42_v2 = vld [vmem:[%s1663_s0 + $0x8] sm:$0xff] }
  0x14   :  { %1297 = vset.pattern.permute.xlu0 %v1354_v0  ;;  %1298 = vset.pattern.permute.xlu1 %v1354_v0  ;;  %v43_v3 = vld [vmem:[%s1663_s0 + $0x10] sm:$0xff]  ;;  %v1180_v4 = vpack.c.bf16 %v42_v2, %v41_v1  ;;  %v44_v5 = vld [vmem:[%s1663_s0 + $0x18] sm:$0xff]  ;;  %v45_v7 = vld [vmem:[%s1663_s0 + $0x20] sm:$0xff] }
  0x15   :  { %v1184_v6 = vpack.c.bf16 %v44_v5, %v43_v3  ;;  %v46_v8 = vld [vmem:[%s1663_s0 + $0x28] sm:$0xff]  ;;  %v57_v10 = vld [vmem:[%s1664_s1] sm:$0xff]  ;;  %v47_v11 = vld [vmem:[%s1663_s0 + $0x30] sm:$0xff] }
  0x16   :  { %1181 = vmatprep.subr.bf16.mxu0 %v1180_v4  ;;  %v1188_v9 = vpack.c.bf16 %v46_v8, %v45_v7  ;;  %v48_v12 = vld [vmem:[%s1663_s0 + $0x38] sm:$0xff]  ;;  %1044 = vmatprep.mubr.f32.mxu0 %v57_v10  ;;  %v73_v13 = vld [vmem:[%s1665_s2] sm:$0xff]  ;;  %v50_v16 = vld [vmem:[%s1663_s0 + $0x48] sm:$0xff] }
  0x17   :  { %1183 = vmatpush3.bf16.msra.mxu0 %v1180_v4  ;;  %v1192_v14 = vpack.c.bf16 %v48_v12, %v47_v11  ;;  %v49_v15 = vld [vmem:[%s1663_s0 + $0x40] sm:$0xff]  ;;  %91 = vperm.xlu0 %1297, %v73_v13   ;;  %v74_v17 = vld [vmem:[%s1665_s2 + $0x8] sm:$0xff]  ;;  %v75_v18 = vld [vmem:[%s1665_s2 + $0x10] sm:$0xff] }
  0x18   :  { %1185 = vmatprep.subr.bf16.mxu0 %v1184_v6  ;;  %101 = vperm.xlu1 %1298, %v75_v18   ;;  %v76_v19 = vld [vmem:[%s1665_s2 + $0x18] sm:$0xff]  ;;  %v1196_v20 = vpack.c.bf16 %v50_v16, %v49_v15  ;;  %v51_v21 = vld [vmem:[%s1663_s0 + $0x50] sm:$0xff]  ;;  %v77_v23 = vld [vmem:[%s1665_s2 + $0x20] sm:$0xff] }
  0x19   :  { %v52_v22 = vld [vmem:[%s1663_s0 + $0x58] sm:$0xff]  ;;  %v78_v24 = vld [vmem:[%s1665_s2 + $0x28] sm:$0xff]  ;;  %v53_v26 = vld [vmem:[%s1663_s0 + $0x60] sm:$0xff] }
  0x1a   :  { %v1200_v25 = vpack.c.bf16 %v52_v22, %v51_v21  ;;  %v54_v27 = vld [vmem:[%s1663_s0 + $0x68] sm:$0xff]  ;;  %v79_v28 = vld [vmem:[%s1665_s2 + $0x30] sm:$0xff]  ;;  %v80_v29 = vld [vmem:[%s1665_s2 + $0x38] sm:$0xff] }
  0x1b   :  { %1187 = vmatpush3.bf16.msra.mxu0 %v1184_v6  ;;  %96 = vperm.xlu0 %1297, %v74_v17   ;;  %v1204_v30 = vpack.c.bf16 %v54_v27, %v53_v26  ;;  %v55_v31 = vld [vmem:[%s1663_s0 + $0x70] sm:$0xff]  ;;  %v56_v32 = vld [vmem:[%s1663_s0 + $0x78] sm:$0xff]  ;;  %v81_v33 = vld [vmem:[%s1665_s2 + $0x40] sm:$0xff] }
  0x1c   :  { %1189 = vmatprep.subr.bf16.mxu0 %v1188_v9  ;;  %106 = vperm.xlu1 %1298, %v76_v19   ;;  %v82_v34 = vld [vmem:[%s1665_s2 + $0x48] sm:$0xff]  ;;  %v1208_v35 = vpack.c.bf16 %v56_v32, %v55_v31  ;;  %v83_v36 = vld [vmem:[%s1665_s2 + $0x50] sm:$0xff]  ;;  %v84_v37 = vld [vmem:[%s1665_s2 + $0x58] sm:$0xff] }
  0x1d   :  { %v85_v38 = vld [vmem:[%s1665_s2 + $0x60] sm:$0xff]  ;;  %v58_v39 = vld [vmem:[%s1664_s1 + $0x8] sm:$0xff]  ;;  %v59_v41 = vld [vmem:[%s1664_s1 + $0x10] sm:$0xff] }
  0x1e   :  { %v86_v40 = vld [vmem:[%s1665_s2 + $0x68] sm:$0xff]  ;;  %v87_v42 = vld [vmem:[%s1665_s2 + $0x70] sm:$0xff]  ;;  %v60_v43 = vld [vmem:[%s1664_s1 + $0x18] sm:$0xff] }
  0x1f   :  { %1191 = vmatpush3.bf16.msra.mxu0 %v1188_v9  ;;  %111 = vperm.xlu0 %1297, %v77_v23   ;;  %v88_v44 = vld [vmem:[%s1665_s2 + $0x78] sm:$0xff]  ;;  %v61_v45 = vld [vmem:[%s1664_s1 + $0x20] sm:$0xff]  ;;  %v62_v47 = vld [vmem:[%s1664_s1 + $0x28] sm:$0xff] }
  0x20   :  { %1193 = vmatprep.subr.bf16.mxu0 %v1192_v14  ;;  %116 = vperm.xlu1 %1298, %v78_v24   ;;  %v378_v46 = vld [vmem:[%s1667_s4] sm:$0xff]  ;;  %v379_v48 = vld [vmem:[%s1667_s4 + $0x8] sm:$0xff]  ;;  %v63_v49 = vld [vmem:[%s1664_s1 + $0x30] sm:$0xff] }
  0x21   :  { %v380_v50 = vld [vmem:[%s1667_s4 + $0x10] sm:$0xff]  ;;  %v64_v51 = vld [vmem:[%s1664_s1 + $0x38] sm:$0xff]  ;;  %v65_v53 = vld [vmem:[%s1664_s1 + $0x40] sm:$0xff] }
  0x22   :  { %v381_v52 = vld [vmem:[%s1667_s4 + $0x18] sm:$0xff]  ;;  %v382_v54 = vld [vmem:[%s1667_s4 + $0x20] sm:$0xff]  ;;  %v66_v55 = vld [vmem:[%s1664_s1 + $0x48] sm:$0xff] }
  0x23   :  { %1195 = vmatpush3.bf16.msra.mxu0 %v1192_v14  ;;  %121 = vperm.xlu0 %1297, %v79_v28   ;;  %v383_v56 = vld [vmem:[%s1667_s4 + $0x28] sm:$0xff]  ;;  %v67_v57 = vld [vmem:[%s1664_s1 + $0x50] sm:$0xff]  ;;  %v68_v59 = vld [vmem:[%s1664_s1 + $0x58] sm:$0xff] }
  0x24   :  { %1197 = vmatprep.subr.bf16.mxu0 %v1196_v20  ;;  %126 = vperm.xlu1 %1298, %v80_v29   ;;  %v384_v58 = vld [vmem:[%s1667_s4 + $0x30] sm:$0xff]  ;;  %v385_v60 = vld [vmem:[%s1667_s4 + $0x38] sm:$0xff]  ;;  %v69_v61 = vld [vmem:[%s1664_s1 + $0x60] sm:$0xff] }
  0x25   :  { %v386_v62 = vld [vmem:[%s1667_s4 + $0x40] sm:$0xff]  ;;  %v70_v63 = vld [vmem:[%s1664_s1 + $0x68] sm:$0xff]  ;;  %v71_v1 = vld [vmem:[%s1664_s1 + $0x70] sm:$0xff] }
  0x26   :  { %v387_v0 = vld [vmem:[%s1667_s4 + $0x48] sm:$0xff]  ;;  %v388_v2 = vld [vmem:[%s1667_s4 + $0x50] sm:$0xff]  ;;  %v72_v3 = vld [vmem:[%s1664_s1 + $0x78] sm:$0xff] }
  0x27   :  { %1199 = vmatpush3.bf16.msra.mxu0 %v1196_v20  ;;  %131 = vperm.xlu0 %1297, %v81_v33   ;;  %v389_v4 = vld [vmem:[%s1667_s4 + $0x58] sm:$0xff]  ;;  %v390_v5 = vld [vmem:[%s1667_s4 + $0x60] sm:$0xff]  ;;  %v391_v6 = vld [vmem:[%s1667_s4 + $0x68] sm:$0xff] }
  0x28   :  { %1201 = vmatprep.subr.bf16.mxu0 %v1200_v25  ;;  %136 = vperm.xlu1 %1298, %v82_v34   ;;  %v392_v7 = vld [vmem:[%s1667_s4 + $0x70] sm:$0xff]  ;;  %v393_v8 = vld [vmem:[%s1667_s4 + $0x78] sm:$0xff]  ;;  %v683_v9 = vld [vmem:[%s1669_s6] sm:$0xff] }
  0x29   :  { %v362_v10 = vld [vmem:[%s1666_s3] sm:$0xff] }
  0x2a   :  { %1100 = vmatprep.mubr.f32.mxu1 %v362_v10 }
  0x2b   :  { %1203 = vmatpush3.bf16.msra.mxu0 %v1200_v25  ;;  %141 = vperm.xlu0 %1297, %v83_v36  }
  0x2c   :  { %1205 = vmatprep.subr.bf16.mxu0 %v1204_v30  ;;  %146 = vperm.xlu1 %1298, %v84_v37  }
  0x2f   :  { %1207 = vmatpush3.bf16.msra.mxu0 %v1204_v30  ;;  %151 = vperm.xlu0 %1297, %v85_v38  }
  0x30   :  { %1209 = vmatprep.subr.bf16.mxu0 %v1208_v35  ;;  %156 = vperm.xlu1 %1298, %v86_v40  }
  0x33   :  { %1211 = vmatpush3.bf16.msra.mxu0 %v1208_v35  ;;  %161 = vperm.xlu0 %1297, %v87_v42  }
  0x34   :  { %166 = vperm.xlu1 %1298, %v88_v44  }
  0x36   :  { %1045 = vmatmul.mubr.f32.vlgmr.msra.gmra.mrb[0].mxu0 %v58_v39 }
  0x37   :  { %1047 = vmatprep.mubr.f32.mxu0 %v59_v41  ;;  %396 = vperm.xlu0 %1297, %v378_v46  }
  0x38   :  { %401 = vperm.xlu1 %1298, %v379_v48  }
  0x3a   :  { %1048 = vmatmul.mubr.f32.gmra.mrb[2].mxu0 %v60_v43 }
  0x3b   :  { %1050 = vmatprep.mubr.f32.mxu0 %v61_v45  ;;  %406 = vperm.xlu0 %1297, %v380_v50  }
  0x3c   :  { %411 = vperm.xlu1 %1298, %v381_v52  }
  0x3e   :  { %1051 = vmatmul.mubr.f32.gmra.mrb[4].mxu0 %v62_v47 }
  0x3f   :  { %1053 = vmatprep.mubr.f32.mxu0 %v63_v49  ;;  %416 = vperm.xlu0 %1297, %v382_v54  }
  0x40   :  { %421 = vperm.xlu1 %1298, %v383_v56  }
  0x42   :  { %1054 = vmatmul.mubr.f32.gmra.mrb[6].mxu0 %v64_v51 }
  0x43   :  { %1056 = vmatprep.mubr.f32.mxu0 %v65_v53  ;;  %426 = vperm.xlu0 %1297, %v384_v58  }
  0x44   :  { %431 = vperm.xlu1 %1298, %v385_v60  }
  0x46   :  { %1057 = vmatmul.mubr.f32.gmra.mrb[8].mxu0 %v66_v55 }
  0x47   :  { %1059 = vmatprep.mubr.f32.mxu0 %v67_v57  ;;  %436 = vperm.xlu0 %1297, %v386_v62  }
  0x48   :  { %441 = vperm.xlu1 %1298, %v387_v0  }
  0x4a   :  { %1060 = vmatmul.mubr.f32.gmra.mrb[10].mxu0 %v68_v59 }
  0x4b   :  { %1062 = vmatprep.mubr.f32.mxu0 %v69_v61  ;;  %446 = vperm.xlu0 %1297, %v388_v2  }
  0x4c   :  { %451 = vperm.xlu1 %1298, %v389_v4  }
  0x4e   :  { %1063 = vmatmul.mubr.f32.gmra.mrb[12].mxu0 %v70_v63 }
  0x4f   :  { %1065 = vmatprep.mubr.f32.mxu0 %v71_v1  ;;  %456 = vperm.xlu0 %1297, %v390_v5  }
  0x50   :  { %461 = vperm.xlu1 %1298, %v391_v6  }
  0x52   :  { %1066 = vmatmul.mubr.f32.gmra.mrb[14].mxu0 %v72_v3 }
  0x53   :  { %466 = vperm.xlu0 %1297, %v392_v7  }
  0x54   :  { %471 = vperm.xlu1 %1298, %v393_v8  }
  0x57   :  { %701 = vperm.xlu0 %1297, %v683_v9  }
  0x96   :  { %v92_v12 = vpop.permute.xlu0 %91 }
  0x97   :  { %v102_v11 = vpop.permute.xlu1 %101 }
  0x9a   :  { %v97_v14 = vpop.permute.xlu0 %96 }
  0x9b   :  { %v107_v13 = vpop.permute.xlu1 %106 }
  0x9e   :  { %v112_v16 = vpop.permute.xlu0 %111 }
  0x9f   :  { %v117_v15 = vpop.permute.xlu1 %116 }
  0xa2   :  { %v122_v25 = vpop.permute.xlu0 %121 }
  0xa3   :  { %v127_v22 = vpop.permute.xlu1 %126 }
  0xa6   :  { %v132_v41 = vpop.permute.xlu0 %131 }
  0xa7   :  { %v137_v38 = vpop.permute.xlu1 %136 }
  0xaa   :  { %v142_v56 = vpop.permute.xlu0 %141 }
  0xab   :  { %v147_v53 = vpop.permute.xlu1 %146 }
  0xae   :  { %v152_v8 = vpop.permute.xlu0 %151 }
  0xaf   :  { %v157_v5 = vpop.permute.xlu1 %156 }
 0x109   :  { %v1046_v17 = vpop.f32.mrb[0].mxu0 }
 0x10a   :  { %v241_v18 = vadd.f32 %v1046_v17, %v97_v14  ;;  %v235_v19 = vpop.f32.mrb[1].mxu0 }
 0x10b   :  { %v236_v20 = vadd.f32 %v235_v19, %v92_v12 }
 0x10c   :  { %v331_v21 = vmul.f32 0.2, %v241_v18  ;;  %vm315_vm0 = vcmp.ge.f32.partialorder %v241_v18, 0.0 }
 0x10d   :  { %v330_v23 = vmul.f32 0.2, %v236_v20  ;;  %v1049_v24 = vpop.f32.mrb[2].mxu0  ;;  %vm314_vm1 = vcmp.ge.f32.partialorder %v236_v20, 0.0 }
 0x10e   :  { %v251_v26 = vadd.f32 %v1049_v24, %v107_v13  ;;  %v245_v27 = vpop.f32.mrb[3].mxu0  ;;  %v347_v28 = vsel %vm315_vm0, %v241_v18, %v331_v21 }
 0x10f   :  { %v246_v29 = vadd.f32 %v245_v27, %v102_v11  ;;  %v346_v30 = vsel %vm314_vm1, %v236_v20, %v330_v23  ;;  %v167_v20 = vpop.permute.xlu1 %166  ;;  %v162_v23 = vpop.permute.xlu0 %161 }
 0x110   :  { %vm317_vm2 = vcmp.ge.f32.partialorder %v251_v26, 0.0  ;;  %v333_v31 = vmul.f32 0.2, %v251_v26  ;;  %v1212_v32 = vpack.c.bf16 %v347_v28, %v346_v30 }
 0x111   :  { %vm316_vm3 = vcmp.ge.f32.partialorder %v246_v29, 0.0  ;;  %v332_v33 = vmul.f32 0.2, %v246_v29  ;;  %v1052_v34 = vpop.f32.mrb[4].mxu0 }
 0x112   :  { %v261_v35 = vadd.f32 %v1052_v34, %v117_v15  ;;  %v255_v36 = vpop.f32.mrb[5].mxu0  ;;  %1213 = vmatprep.subr.bf16.mxu1 %v1212_v32  ;;  %v349_v37 = vsel %vm317_vm2, %v251_v26, %v333_v31 }
 0x113   :  { %v256_v39 = vadd.f32 %v255_v36, %v112_v16  ;;  %1215 = vmatpush3.bf16.msra.mxu1 %v1212_v32  ;;  %v348_v40 = vsel %vm316_vm3, %v246_v29, %v332_v33  ;;  %v364_v36 = vld [vmem:[%s1666_s3 + $0x10] sm:$0xff] }
 0x114   :  { %vm319_vm4 = vcmp.ge.f32.partialorder %v261_v35, 0.0  ;;  %v335_v42 = vmul.f32 0.2, %v261_v35  ;;  %v1216_v43 = vpack.c.bf16 %v349_v37, %v348_v40  ;;  %v365_v37 = vld [vmem:[%s1666_s3 + $0x18] sm:$0xff]  ;;  %v368_v40 = vld [vmem:[%s1666_s3 + $0x30] sm:$0xff] }
 0x115   :  { %vm318_vm5 = vcmp.ge.f32.partialorder %v256_v39, 0.0  ;;  %v334_v44 = vmul.f32 0.2, %v256_v39  ;;  %v1055_v45 = vpop.f32.mrb[6].mxu0 }
 0x116   :  { %v271_v46 = vadd.f32 %v1055_v45, %v127_v22  ;;  %v265_v47 = vpop.f32.mrb[7].mxu0  ;;  %1217 = vmatprep.subr.bf16.mxu1 %v1216_v43  ;;  %v351_v48 = vsel %vm319_vm4, %v261_v35, %v335_v42  ;;  %v363_v35 = vld [vmem:[%s1666_s3 + $0x8] sm:$0xff]  ;;  %v370_v42 = vld [vmem:[%s1666_s3 + $0x40] sm:$0xff]  ;;  %v373_v45 = vld [vmem:[%s1666_s3 + $0x58] sm:$0xff] }
 0x117   :  { %v266_v49 = vadd.f32 %v265_v47, %v122_v25  ;;  %1219 = vmatpush3.bf16.msra.mxu1 %v1216_v43  ;;  %v350_v50 = vsel %vm318_vm5, %v256_v39, %v334_v44  ;;  %v367_v39 = vld [vmem:[%s1666_s3 + $0x28] sm:$0xff]  ;;  %v372_v44 = vld [vmem:[%s1666_s3 + $0x50] sm:$0xff] }
 0x118   :  { %vm321_vm6 = vcmp.ge.f32.partialorder %v271_v46, 0.0  ;;  %v337_v51 = vmul.f32 0.2, %v271_v46  ;;  %v1220_v52 = vpack.c.bf16 %v351_v48, %v350_v50  ;;  %v371_v43 = vld [vmem:[%s1666_s3 + $0x48] sm:$0xff]  ;;  %v376_v48 = vld [vmem:[%s1666_s3 + $0x70] sm:$0xff]  ;;  %v667_v50 = vld [vmem:[#allocation2] sm:$0xff] }
 0x119   :  { %vm320_vm7 = vcmp.ge.f32.partialorder %v266_v49, 0.0  ;;  %v336_v54 = vmul.f32 0.2, %v266_v49  ;;  %v1058_v55 = vpop.f32.mrb[8].mxu0  ;;  %v375_v47 = vld [vmem:[%s1666_s3 + $0x68] sm:$0xff]  ;;  %1156 = vmatprep.mubr.f32.mxu0 %v667_v50 }
 0x11a   :  { %v281_v57 = vadd.f32 %v1058_v55, %v137_v38  ;;  %v275_v58 = vpop.f32.mrb[9].mxu0  ;;  %1221 = vmatprep.subr.bf16.mxu1 %v1220_v52  ;;  %v353_v59 = vsel %vm321_vm6, %v271_v46, %v337_v51  ;;  %v366_v38 = vld [vmem:[%s1666_s3 + $0x20] sm:$0xff] }
 0x11b   :  { %v276_v60 = vadd.f32 %v275_v58, %v132_v41  ;;  %1223 = vmatpush3.bf16.msra.mxu1 %v1220_v52  ;;  %v352_v61 = vsel %vm320_vm7, %v266_v49, %v336_v54  ;;  %v369_v41 = vld [vmem:[%s1666_s3 + $0x38] sm:$0xff]  ;;  %v374_v46 = vld [vmem:[%s1666_s3 + $0x60] sm:$0xff]  ;;  %v402_v52 = vpop.permute.xlu1 %401 }
 0x11c   :  { %vm323_vm8 = vcmp.ge.f32.partialorder %v281_v57, 0.0  ;;  %v339_v62 = vmul.f32 0.2, %v281_v57  ;;  %v1224_v63 = vpack.c.bf16 %v353_v59, %v352_v61  ;;  %v377_v49 = vld [vmem:[%s1666_s3 + $0x78] sm:$0xff]  ;;  %v675_v51 = vld [vmem:[#allocation2 + $0x40] sm:$0xff]  ;;  %s1355_s3 = smov [#allocation5]  }
 0x11d   :  { %vm322_vm9 = vcmp.ge.f32.partialorder %v276_v60, 0.0  ;;  %v338_v0 = vmul.f32 0.2, %v276_v60  ;;  %v1061_v1 = vpop.f32.mrb[10].mxu0  ;;  %s907_s6 = sshll.u32 %s1355_s3, 4  ;;  %s908_s6 = int_to_ptr.vmem [resolvable:$true] %s907_s6 }
 0x11e   :  { %v291_v2 = vadd.f32 %v1061_v1, %v147_v53  ;;  %v285_v3 = vpop.f32.mrb[11].mxu0  ;;  %1225 = vmatprep.subr.bf16.mxu1 %v1224_v63  ;;  %v355_v4 = vsel %vm323_vm8, %v281_v57, %v339_v62  ;;  %v397_v53 = vpop.permute.xlu0 %396  ;;  %s1325_s21 = scalar_lea.vmem %s908_s6, 16  ;;  %s1329_s2 = scalar_lea.vmem %s908_s6, 32 }
 0x11f   :  { %v286_v6 = vadd.f32 %v285_v3, %v142_v56  ;;  %1227 = vmatpush3.bf16.msra.mxu1 %v1224_v63  ;;  %v354_v7 = vsel %vm322_vm9, %v276_v60, %v338_v0  ;;  %v412_v54 = vpop.permute.xlu1 %411  ;;  %p1326_p8 = scmp.ne.s32.totalorder %s908_s6, %s1325_s21  ;;  %p1330_p9 = scmp.lt.s32.totalorder %s908_s6, %s908_s6 }
 0x120   :  { %vm325_vm10 = vcmp.ge.f32.partialorder %v291_v2, 0.0  ;;  %v341_v9 = vmul.f32 0.2, %v291_v2  ;;  %v1228_v10 = vpack.c.bf16 %v355_v4, %v354_v7  ;;  %p1331_p10 = scmp.lt.s32.totalorder %s1329_s2, %s1325_s21 }
 0x121   :  { %vm324_vm11 = vcmp.ge.f32.partialorder %v286_v6, 0.0  ;;  %v340_v11 = vmul.f32 0.2, %v286_v6  ;;  %v1064_v12 = vpop.f32.mrb[12].mxu0 }
 0x122   :  { %v301_v13 = vadd.f32 %v1064_v12, %v157_v5  ;;  %v295_v14 = vpop.f32.mrb[13].mxu0  ;;  %1229 = vmatprep.subr.bf16.mxu1 %v1228_v10  ;;  %v357_v15 = vsel %vm325_vm10, %v291_v2, %v341_v9  ;;  %v407_v55 = vpop.permute.xlu0 %406  ;;  %p1332_p11 = por %p1331_p10, %p1330_p9 }
 0x123   :  { %v296_v16 = vadd.f32 %v295_v14, %v152_v8  ;;  %1231 = vmatpush3.bf16.msra.mxu1 %v1228_v10  ;;  %v356_v17 = vsel %vm324_vm11, %v286_v6, %v340_v11  ;;  %v422_v56 = vpop.permute.xlu1 %421 }
 0x124   :  { %vm327_vm12 = vcmp.ge.f32.partialorder %v301_v13, 0.0  ;;  %v343_v18 = vmul.f32 0.2, %v301_v13  ;;  %v1232_v19 = vpack.c.bf16 %v357_v15, %v356_v17  ;;  %p1333_p12 = pnand %p1332_p11, %p1326_p8 }
 0x125   :  { %vm326_vm13 = vcmp.ge.f32.partialorder %v296_v16, 0.0  ;;  %v342_v21 = vmul.f32 0.2, %v296_v16  ;;  %v1067_v22 = vpop.f32.mrb[14].mxu0 }
 0x126   :  { %v311_v24 = vadd.f32 %v1067_v22, %v167_v20  ;;  %v305_v25 = vpop.f32.mrb[15].mxu0  ;;  %1233 = vmatprep.subr.bf16.mxu1 %v1232_v19  ;;  %v359_v26 = vsel %vm327_vm12, %v301_v13, %v343_v18  ;;  %v417_v57 = vpop.permute.xlu0 %416 }
 0x127   :  { %v306_v27 = vadd.f32 %v305_v25, %v162_v23  ;;  %1235 = vmatpush3.bf16.msra.mxu1 %v1232_v19  ;;  %v358_v28 = vsel %vm326_vm13, %v296_v16, %v342_v21  ;;  %v432_v63 = vpop.permute.xlu1 %431 }
 0x128   :  { %vm329_vm14 = vcmp.ge.f32.partialorder %v311_v24, 0.0  ;;  %v345_v29 = vmul.f32 0.2, %v311_v24  ;;  %v1236_v30 = vpack.c.bf16 %v359_v26, %v358_v28 }
 0x129   :  { %vm328_vm15 = vcmp.ge.f32.partialorder %v306_v27, 0.0  ;;  %v344_v31 = vmul.f32 0.2, %v306_v27 }
 0x12a   :  { %1237 = vmatprep.subr.bf16.mxu1 %v1236_v30  ;;  %v361_v32 = vsel %vm329_vm14, %v311_v24, %v345_v29  ;;  %v427_v2 = vpop.permute.xlu0 %426 }
 0x12b   :  { %1239 = vmatpush3.bf16.msra.mxu1 %v1236_v30  ;;  %v360_v33 = vsel %vm328_vm15, %v306_v27, %v344_v31  ;;  %v442_v15 = vpop.permute.xlu1 %441 }
 0x12c   :  { %v1240_v34 = vpack.c.bf16 %v361_v32, %v360_v33 }
 0x12e   :  { %1241 = vmatprep.subr.bf16.mxu1 %v1240_v34  ;;  %v437_v18 = vpop.permute.xlu0 %436 }
 0x12f   :  { %1243 = vmatpush3.bf16.msra.mxu1 %v1240_v34  ;;  %v452_v30 = vpop.permute.xlu1 %451 }
 0x132   :  { %1101 = vmatmul.mubr.f32.vlgmr.msra.gmra.mrb[0].mxu1 %v363_v35  ;;  %v447_v33 = vpop.permute.xlu0 %446 }
 0x133   :  { %1103 = vmatprep.mubr.f32.mxu1 %v364_v36 }
 0x136   :  { %1104 = vmatmul.mubr.f32.gmra.mrb[2].mxu1 %v365_v37 }
 0x137   :  { %1106 = vmatprep.mubr.f32.mxu1 %v366_v38 }
 0x13a   :  { %1107 = vmatmul.mubr.f32.gmra.mrb[4].mxu1 %v367_v39 }
 0x13b   :  { %1109 = vmatprep.mubr.f32.mxu1 %v368_v40 }
 0x13e   :  { %1110 = vmatmul.mubr.f32.gmra.mrb[6].mxu1 %v369_v41 }
 0x13f   :  { %1112 = vmatprep.mubr.f32.mxu1 %v370_v42 }
 0x142   :  { %1113 = vmatmul.mubr.f32.gmra.mrb[8].mxu1 %v371_v43 }
 0x143   :  { %1115 = vmatprep.mubr.f32.mxu1 %v372_v44 }
 0x146   :  { %1116 = vmatmul.mubr.f32.gmra.mrb[10].mxu1 %v373_v45 }
 0x147   :  { %1118 = vmatprep.mubr.f32.mxu1 %v374_v46  ;;  %v462_v46 = vpop.permute.xlu1 %461 }
 0x14a   :  { %1119 = vmatmul.mubr.f32.gmra.mrb[12].mxu1 %v375_v47 }
 0x14b   :  { %1121 = vmatprep.mubr.f32.mxu1 %v376_v48 }
 0x14e   :  { %1122 = vmatmul.mubr.f32.gmra.mrb[14].mxu1 %v377_v49  ;;  %v457_v49 = vpop.permute.xlu0 %456 }
 0x14f   :  { %1168 = vmatprep.mubr.f32.mxu1 %v675_v51 }
 0x205   :  { %v1102_v58 = vpop.f32.mrb[0].mxu1 }
 0x206   :  { %v546_v59 = vadd.f32 %v1102_v58, %v402_v52  ;;  %v540_v60 = vpop.f32.mrb[1].mxu1 }
 0x207   :  { %v541_v61 = vadd.f32 %v540_v60, %v397_v53 }
 0x208   :  { %vm620_vm0 = vcmp.ge.f32.partialorder %v546_v59, 0.0  ;;  %v636_v62 = vmul.f32 0.2, %v546_v59 }
 0x209   :  { %vm619_vm1 = vcmp.ge.f32.partialorder %v541_v61, 0.0  ;;  %v635_v0 = vmul.f32 0.2, %v541_v61  ;;  %v1105_v1 = vpop.f32.mrb[2].mxu1 }
 0x20a   :  { %v652_v3 = vsel %vm620_vm0, %v546_v59, %v636_v62  ;;  %v556_v4 = vadd.f32 %v1105_v1, %v412_v54  ;;  %v550_v5 = vpop.f32.mrb[3].mxu1 }
 0x20b   :  { %v651_v6 = vsel %vm619_vm1, %v541_v61, %v635_v0  ;;  %v551_v7 = vadd.f32 %v550_v5, %v407_v55  ;;  %v472_v61 = vpop.permute.xlu1 %471  ;;  %v467_v0 = vpop.permute.xlu0 %466 }
 0x20c   :  { %v1244_v8 = vpack.c.bf16 %v652_v3, %v651_v6  ;;  %vm622_vm2 = vcmp.ge.f32.partialorder %v556_v4, 0.0  ;;  %v638_v9 = vmul.f32 0.2, %v556_v4 }
 0x20d   :  { %vm621_vm3 = vcmp.ge.f32.partialorder %v551_v7, 0.0  ;;  %v637_v10 = vmul.f32 0.2, %v551_v7  ;;  %v1108_v11 = vpop.f32.mrb[4].mxu1 }
 0x20e   :  { %v654_v12 = vsel %vm622_vm2, %v556_v4, %v638_v9  ;;  %v566_v13 = vadd.f32 %v1108_v11, %v422_v56  ;;  %v560_v14 = vpop.f32.mrb[5].mxu1  ;;  %1245 = vmatprep.subr.bf16.mxu0 %v1244_v8  ;;  %1276 = vmatprep.subr.bf16.mxu1 %v1244_v8 }
 0x20f   :  { %v653_v16 = vsel %vm621_vm3, %v551_v7, %v637_v10  ;;  %v561_v17 = vadd.f32 %v560_v14, %v417_v57  ;;  %1247 = vmatpush3.bf16.msra.mxu0 %v1244_v8  ;;  %1284 = vmatpush3.bf16.msra.mxu1 %v1244_v8  ;;  %v669_v14 = vld [vmem:[#allocation2 + $0x10] sm:$0xff] }
 0x210   :  { %v1248_v19 = vpack.c.bf16 %v654_v12, %v653_v16  ;;  %vm624_vm4 = vcmp.ge.f32.partialorder %v566_v13, 0.0  ;;  %v640_v20 = vmul.f32 0.2, %v566_v13  ;;  %v668_v12 = vld [vmem:[#allocation2 + $0x8] sm:$0xff]  ;;  %v670_v16 = vld [vmem:[#allocation2 + $0x18] sm:$0xff] }
 0x211   :  { %vm623_vm5 = vcmp.ge.f32.partialorder %v561_v17, 0.0  ;;  %v639_v21 = vmul.f32 0.2, %v561_v17  ;;  %v1111_v22 = vpop.f32.mrb[6].mxu1 }
 0x212   :  { %v656_v23 = vsel %vm624_vm4, %v566_v13, %v640_v20  ;;  %v576_v24 = vadd.f32 %v1111_v22, %v432_v63  ;;  %v570_v25 = vpop.f32.mrb[7].mxu1  ;;  %1249 = vmatprep.subr.bf16.mxu0 %v1248_v19  ;;  %1277 = vmatprep.subr.bf16.mxu1 %v1248_v19  ;;  %v676_v13 = vld [vmem:[#allocation2 + $0x48] sm:$0xff]  ;;  %v673_v22 = vld [vmem:[#allocation2 + $0x30] sm:$0xff] }
 0x213   :  { %v655_v26 = vsel %vm623_vm5, %v561_v17, %v639_v21  ;;  %v571_v27 = vadd.f32 %v570_v25, %v427_v2  ;;  %1251 = vmatpush3.bf16.msra.mxu0 %v1248_v19  ;;  %1285 = vmatpush3.bf16.msra.mxu1 %v1248_v19  ;;  %v678_v17 = vld [vmem:[#allocation2 + $0x58] sm:$0xff]  ;;  %v679_v19 = vld [vmem:[#allocation2 + $0x60] sm:$0xff]  ;;  %v672_v20 = vld [vmem:[#allocation2 + $0x28] sm:$0xff] }
 0x214   :  { %v1252_v28 = vpack.c.bf16 %v656_v23, %v655_v26  ;;  %vm626_vm6 = vcmp.ge.f32.partialorder %v576_v24, 0.0  ;;  %v642_v29 = vmul.f32 0.2, %v576_v24  ;;  %v680_v21 = vld [vmem:[#allocation2 + $0x68] sm:$0xff]  ;;  %v681_v23 = vld [vmem:[#allocation2 + $0x70] sm:$0xff]  ;;  %v682_v25 = vld [vmem:[#allocation2 + $0x78] sm:$0xff]  ;;  %v702_v26 = vpop.permute.xlu0 %701 }
 0x215   :  { %vm625_vm7 = vcmp.ge.f32.partialorder %v571_v27, 0.0  ;;  %v641_v31 = vmul.f32 0.2, %v571_v27  ;;  %v1114_v32 = vpop.f32.mrb[8].mxu1 }
 0x216   :  { %v658_v34 = vsel %vm626_vm6, %v576_v24, %v642_v29  ;;  %v586_v35 = vadd.f32 %v1114_v32, %v442_v15  ;;  %v580_v36 = vpop.f32.mrb[9].mxu1  ;;  %1253 = vmatprep.subr.bf16.mxu0 %v1252_v28  ;;  %1278 = vmatprep.subr.bf16.mxu1 %v1252_v28  ;;  %v677_v15 = vld [vmem:[#allocation2 + $0x50] sm:$0xff]  ;;  %v674_v24 = vld [vmem:[#allocation2 + $0x38] sm:$0xff] }
 0x217   :  { %v657_v37 = vsel %vm625_vm7, %v571_v27, %v641_v31  ;;  %v581_v38 = vadd.f32 %v580_v36, %v437_v18  ;;  %1255 = vmatpush3.bf16.msra.mxu0 %v1252_v28  ;;  %1286 = vmatpush3.bf16.msra.mxu1 %v1252_v28  ;;  %v671_v18 = vld [vmem:[#allocation2 + $0x20] sm:$0xff] }
 0x218   :  { %v1256_v39 = vpack.c.bf16 %v658_v34, %v657_v37  ;;  %vm628_vm8 = vcmp.ge.f32.partialorder %v586_v35, 0.0  ;;  %v644_v40 = vmul.f32 0.2, %v586_v35 }
 0x219   :  { %vm627_vm9 = vcmp.ge.f32.partialorder %v581_v38, 0.0  ;;  %v643_v41 = vmul.f32 0.2, %v581_v38  ;;  %v1117_v42 = vpop.f32.mrb[10].mxu1 }
 0x21a   :  { %v660_v43 = vsel %vm628_vm8, %v586_v35, %v644_v40  ;;  %v596_v44 = vadd.f32 %v1117_v42, %v452_v30  ;;  %v590_v45 = vpop.f32.mrb[11].mxu1  ;;  %1257 = vmatprep.subr.bf16.mxu0 %v1256_v39  ;;  %1279 = vmatprep.subr.bf16.mxu1 %v1256_v39 }
 0x21b   :  { %v659_v47 = vsel %vm627_vm9, %v581_v38, %v643_v41  ;;  %v591_v48 = vadd.f32 %v590_v45, %v447_v33  ;;  %1259 = vmatpush3.bf16.msra.mxu0 %v1256_v39  ;;  %1287 = vmatpush3.bf16.msra.mxu1 %v1256_v39 }
 0x21c   :  { %v1260_v50 = vpack.c.bf16 %v660_v43, %v659_v47  ;;  %vm630_vm10 = vcmp.ge.f32.partialorder %v596_v44, 0.0  ;;  %v646_v51 = vmul.f32 0.2, %v596_v44 }
 0x21d   :  { %vm629_vm11 = vcmp.ge.f32.partialorder %v591_v48, 0.0  ;;  %v645_v52 = vmul.f32 0.2, %v591_v48  ;;  %v1120_v53 = vpop.f32.mrb[12].mxu1 }
 0x21e   :  { %v662_v54 = vsel %vm630_vm10, %v596_v44, %v646_v51  ;;  %v606_v55 = vadd.f32 %v1120_v53, %v462_v46  ;;  %v600_v56 = vpop.f32.mrb[13].mxu1  ;;  %1261 = vmatprep.subr.bf16.mxu0 %v1260_v50  ;;  %1280 = vmatprep.subr.bf16.mxu1 %v1260_v50 }
 0x21f   :  { %v661_v57 = vsel %vm629_vm11, %v591_v48, %v645_v52  ;;  %v601_v58 = vadd.f32 %v600_v56, %v457_v49  ;;  %1263 = vmatpush3.bf16.msra.mxu0 %v1260_v50  ;;  %1288 = vmatpush3.bf16.msra.mxu1 %v1260_v50 }
 0x220   :  { %v1264_v59 = vpack.c.bf16 %v662_v54, %v661_v57  ;;  %vm632_vm12 = vcmp.ge.f32.partialorder %v606_v55, 0.0  ;;  %v648_v60 = vmul.f32 0.2, %v606_v55 }
 0x221   :  { %vm631_vm13 = vcmp.ge.f32.partialorder %v601_v58, 0.0  ;;  %v647_v62 = vmul.f32 0.2, %v601_v58  ;;  %v1123_v63 = vpop.f32.mrb[14].mxu1 }
 0x222   :  { %v664_v1 = vsel %vm632_vm12, %v606_v55, %v648_v60  ;;  %v616_v2 = vadd.f32 %v1123_v63, %v472_v61  ;;  %v610_v3 = vpop.f32.mrb[15].mxu1  ;;  %1265 = vmatprep.subr.bf16.mxu0 %v1264_v59  ;;  %1281 = vmatprep.subr.bf16.mxu1 %v1264_v59 }
 0x223   :  { %v663_v4 = vsel %vm631_vm13, %v601_v58, %v647_v62  ;;  %v611_v5 = vadd.f32 %v610_v3, %v467_v0  ;;  %1267 = vmatpush3.bf16.msra.mxu0 %v1264_v59  ;;  %1289 = vmatpush3.bf16.msra.mxu1 %v1264_v59 }
 0x224   :  { %v1268_v6 = vpack.c.bf16 %v664_v1, %v663_v4  ;;  %vm634_vm14 = vcmp.ge.f32.partialorder %v616_v2, 0.0  ;;  %v650_v7 = vmul.f32 0.2, %v616_v2 }
 0x225   :  { %vm633_vm15 = vcmp.ge.f32.partialorder %v611_v5, 0.0  ;;  %v649_v8 = vmul.f32 0.2, %v611_v5 }
 0x226   :  { %v666_v9 = vsel %vm634_vm14, %v616_v2, %v650_v7  ;;  %1269 = vmatprep.subr.bf16.mxu0 %v1268_v6  ;;  %1282 = vmatprep.subr.bf16.mxu1 %v1268_v6 }
 0x227   :  { %v665_v10 = vsel %vm633_vm15, %v611_v5, %v649_v8  ;;  %1271 = vmatpush3.bf16.msra.mxu0 %v1268_v6  ;;  %1290 = vmatpush3.bf16.msra.mxu1 %v1268_v6 }
 0x228   :  { %v1272_v11 = vpack.c.bf16 %v666_v9, %v665_v10 }
 0x22a   :  { %1273 = vmatprep.subr.bf16.mxu0 %v1272_v11  ;;  %1283 = vmatprep.subr.bf16.mxu1 %v1272_v11 }
 0x22b   :  { %1275 = vmatpush3.bf16.msra.mxu0 %v1272_v11  ;;  %1291 = vmatpush3.bf16.msra.mxu1 %v1272_v11 }
 0x22e   :  { %1157 = vmatmul.mubr.f32.vlgmr.msra.gmra.mrb[16].mxu0 %v668_v12  ;;  %1169 = vmatmul.mubr.f32.vlgmr.msra.gmra.mrb[16].mxu1 %v676_v13 }
 0x22f   :  { %1159 = vmatprep.mubr.f32.mxu0 %v669_v14  ;;  %1171 = vmatprep.mubr.f32.mxu1 %v677_v15 }
 0x232   :  { %1160 = vmatmul.mubr.f32.gmra.mrb[18].mxu0 %v670_v16  ;;  %1172 = vmatmul.mubr.f32.gmra.mrb[18].mxu1 %v678_v17 }
 0x233   :  { %1162 = vmatprep.mubr.f32.mxu0 %v671_v18  ;;  %1174 = vmatprep.mubr.f32.mxu1 %v679_v19 }
 0x236   :  { %1163 = vmatmul.mubr.f32.gmra.mrb[20].mxu0 %v672_v20  ;;  %1175 = vmatmul.mubr.f32.gmra.mrb[20].mxu1 %v680_v21 }
 0x237   :  { %1165 = vmatprep.mubr.f32.mxu0 %v673_v22  ;;  %1177 = vmatprep.mubr.f32.mxu1 %v681_v23 }
 0x23a   :  { %1166 = vmatmul.mubr.f32.gmra.mrb[22].mxu0 %v674_v24  ;;  %1178 = vmatmul.mubr.f32.gmra.mrb[22].mxu1 %v682_v25 }
 0x301   :  { %v1158_v27 = vpop.f32.mrb[16].mxu0  ;;  %v1170_v28 = vpop.f32.mrb[16].mxu1 }
 0x302   :  { %v830_v29 = vpop.f32.mrb[17].mxu0  ;;  %v863_v30 = vpop.f32.mrb[17].mxu1 }
 0x303   :  { %v831_v31 = vadd.f32 %v830_v29, %v702_v26 }
 0x305   :  { %v894_v32 = vsub.f32 0.0, %v831_v31  ;;  %v1161_v33 = vpop.f32.mrb[18].mxu0  ;;  %v1173_v34 = vpop.f32.mrb[18].mxu1 }
 0x306   :  { %v839_v35 = vpop.f32.mrb[19].mxu0  ;;  %v871_v36 = vpop.f32.mrb[19].mxu1 }
 0x307   :  { %v895_v37 = vmul.f32 1.442695, %v894_v32 }
 0x309   :  { %1299 = vpow2.f32 %v895_v37  ;;  %v1164_v38 = vpop.f32.mrb[20].mxu0  ;;  %v1176_v39 = vpop.f32.mrb[20].mxu1 }
 0x30a   :  { %v847_v40 = vpop.f32.mrb[21].mxu0  ;;  %v879_v41 = vpop.f32.mrb[21].mxu1 }
 0x30d   :  { %v1167_v42 = vpop.f32.mrb[22].mxu0  ;;  %v1179_v43 = vpop.f32.mrb[22].mxu1 }
 0x30e   :  { %v855_v44 = vpop.f32.mrb[23].mxu0  ;;  %v887_v45 = vpop.f32.mrb[23].mxu1 }
 0x313   :  { %v1300_v46 = vpop.eup %1299 }
 0x314   :  { %v897_v47 = vadd.f32 1.0, %v1300_v46 }
 0x316   :  { %1301 = vrcp.f32 %v897_v47 }
 0x320   :  { %v1302_v48 = vpop.eup %1301 }
 0x321   :  { %900 = vst [vmem:[#allocation5] sm:$0x1] %v1302_v48 }
 0x322   :  { %1336 = shalt.err (!%p1333_p12)
}
 0x323   :  { %s1337_s22 = scalar_lea.hbm %s1670_s7, 16 }
 0x324   :  { %p1338_p13 = scmp.ne.s32.totalorder %s1670_s7, %s1337_s22  ;;  %p1341_p0 = scmp.lt.u32.totalorder %s1337_s22, %s1670_s7 }
 0x326   :  { %p1343_p1 = pnand %p1341_p0, %p1338_p13 }
 0x328   :  { %1346 = shalt.err (!%p1343_p1)
}
 0x329   :  { %910 = dma.vmem_to_hbm [thread:$0]  %s908_s6, 16, %s1670_s7, [#allocation4]  }
 0x32a   :  { %1349 = dma.done.wait [#allocation4], 16  }
 0x32b   :  { %1350 = vsyncadd [#allocation4], 4294967280 }
 0x32c   :  { %914 = vsyncpa [#allocation3], 1 }
 0x32d   :  { %915 = vsyncpa [#allocation4], 1 }

</bundles_post_ra>
